<compile_context>
chip_gen: v6e
topology: v6e:2x2x1
jax: 0.10.0
libtpu: 0.0.40
codegen_flags: <defaults>
</compile_context>

<pallas_src>
import functools

import jax
import jax.numpy as jnp
from jax.experimental import pallas as pl
from jax.experimental.pallas import tpu as pltpu

_EPS_NORMALIZE = 1e-12          # torch.nn.functional.normalize default eps
_EPS_PAIRNORM = 1e-6            # PairNorm epsilon from the reference code
_LANE = 128


# ---------------------------------------------------------------------------
# Generation-aware sizing
# ---------------------------------------------------------------------------
@functools.lru_cache(maxsize=None)
def _vmem_limit_bytes():
    """Scoped-VMEM budget: ~5/8 of physical, capped at 64 MiB (safe on v7x)."""
    cap = 64 * 1024 * 1024
    try:
        cap = int(pltpu.get_tpu_info().vmem_capacity_bytes)
    except Exception:
        pass
    return max(16 * 1024 * 1024, min(int(cap * 5 // 8), 64 * 1024 * 1024))


@functools.lru_cache(maxsize=None)
def _tile_target_bytes():
    # In + out blocks are double-buffered and the body keeps f32 working copies,
    # so ~1/8 of the scoped budget per block leaves comfortable headroom.
    return max(2 * 1024 * 1024, min(12 * 1024 * 1024, _vmem_limit_bytes() // 8))


def _sublane_align(itemsize):
    if itemsize >= 4:
        return 8
    if itemsize == 2:
        return 16
    return 32


def _choose_tile_rows(n, d, itemsize, tile_rows=None, align=None):
    """Row-tile size: native-sublane (and optionally MXU-depth) aligned."""
    a = _sublane_align(itemsize)
    if align is not None:
        a = max(a, align)
    if tile_rows is not None:
        t = int(tile_rows)
    else:
        t = _tile_target_bytes() // max(1, d * itemsize)
    t = max(a, (t // a) * a)
    if t >= n:
        return n                 # single full block (always a legal block shape)
    return t


def _unpad(out, d):
    return out if out.shape[1] == d else out[:, :d]


# ---------------------------------------------------------------------------
# Kernels
# ---------------------------------------------------------------------------
def _ln_kernel(x_ref, o_ref, *, d_true):
    """x = x - mean(dim=1); x = F.normalize(x, dim=1). Purely row-wise."""
    x = x_ref[...].astype(jnp.float32)
    mean = jnp.sum(x, axis=1, keepdims=True) * (1.0 / d_true)
    xc = x - mean
    if d_true < x.shape[1]:      # lane-padded: keep padded columns exactly zero
        col_ids = jax.lax.broadcasted_iota(jnp.int32, x.shape, 1)
        xc = jnp.where(col_ids < d_true, xc, 0.0)
    sumsq = jnp.sum(xc * xc, axis=1, keepdims=True)
    inv = jax.lax.rsqrt(jnp.maximum(sumsq, _EPS_NORMALIZE * _EPS_NORMALIZE))
    o_ref[...] = (xc * inv).astype(o_ref.dtype)


def _col_stats_kernel(x_ref, mu_ref, pns_ref, *, n_rows, tile_rows, scale):
    """PN pass 1: accumulate column sums & total sum-sq; finalize to mu and
    the folded PN scalar scale*rsqrt(eps + mean rownorm^2).

    NOTE: mean rownorm^2 is recovered as sum(x^2)/N - ||mu||^2, which can
    cancel catastrophically for ill-conditioned inputs; the fused single-block
    path below computes centered stats exactly.
    """
    i = pl.program_id(0)

    @pl.when(i == 0)
    def _():
        mu_ref[...] = jnp.zeros_like(mu_ref)
        pns_ref[...] = jnp.zeros_like(pns_ref)

    x = x_ref[...].astype(jnp.float32)
    # Mask rows past N in the partial last tile (their contents are undefined).
    row_ids = i * tile_rows + jax.lax.broadcasted_iota(jnp.int32, x.shape, 0)
    x = jnp.where(row_ids < n_rows, x, 0.0)

    mu_ref[...] += jnp.sum(x, axis=0, keepdims=True)
    pns_ref[...] += jnp.sum(x * x)

    @pl.when(i == pl.num_programs(0) - 1)
    def _():
        inv_n = 1.0 / n_rows
        mu = mu_ref[...] * inv_n
        mu_ref[...] = mu
        mean_sq = jnp.maximum(
            pns_ref[...] * inv_n - jnp.sum(mu * mu, keepdims=True), 0.0)
        pns_ref[...] = scale * jax.lax.rsqrt(_EPS_PAIRNORM + mean_sq)


def _pn_apply_kernel(mu_ref, pns_ref, x_ref, o_ref):
    x = x_ref[...].astype(jnp.float32)
    o_ref[...] = ((x - mu_ref[...]) * pns_ref[...]).astype(o_ref.dtype)


def _pn_si_apply_kernel(mu_ref, x_ref, o_ref, *, scale):
    x = x_ref[...].astype(jnp.float32)
    xc = x - mu_ref[...]
    inv = jax.lax.rsqrt(_EPS_PAIRNORM + jnp.sum(xc * xc, axis=1, keepdims=True))
    o_ref[...] = (scale * xc * inv).astype(o_ref.dtype)


def _pn_scs_apply_kernel(mu_ref, x_ref, o_ref, *, scale):
    x = x_ref[...].astype(jnp.float32)
    inv = jax.lax.rsqrt(_EPS_PAIRNORM + jnp.sum(x * x, axis=1, keepdims=True))
    o_ref[...] = (scale * x * inv - mu_ref[...]).astype(o_ref.dtype)


# Fused single-block PN variants (whole array in one VMEM tile): one HBM read,
# no stats round trip, numerically exact (centered accumulation).
def _pn_fused_kernel(x_ref, o_ref, *, scale):
    x = x_ref[...].astype(jnp.float32)
    xc = x - jnp.mean(x, axis=0, keepdims=True)
    mean_sq = jnp.mean(jnp.sum(xc * xc, axis=1))
    o_ref[...] = (xc * (scale * jax.lax.rsqrt(_EPS_PAIRNORM + mean_sq))
                  ).astype(o_ref.dtype)


def _pn_si_fused_kernel(x_ref, o_ref, *, scale):
    x = x_ref[...].astype(jnp.float32)
    xc = x - jnp.mean(x, axis=0, keepdims=True)
    inv = jax.lax.rsqrt(_EPS_PAIRNORM + jnp.sum(xc * xc, axis=1, keepdims=True))
    o_ref[...] = (scale * xc * inv).astype(o_ref.dtype)


def _pn_scs_fused_kernel(x_ref, o_ref, *, scale):
    x = x_ref[...].astype(jnp.float32)
    mu = jnp.mean(x, axis=0, keepdims=True)
    inv = jax.lax.rsqrt(_EPS_PAIRNORM + jnp.sum(x * x, axis=1, keepdims=True))
    o_ref[...] = (scale * x * inv - mu).astype(o_ref.dtype)


def _cn_sim_kernel(x_ref, sim_ref, acc_ref, *, tau, n_rows, tile_rows, d_true,
                   mxu_dtype):
    """CN pass 1: sim = softmax(H^T H / tau, dim=1), accumulated over row tiles
    in an f32 scratch and emitted once in the MXU dtype."""
    i = pl.program_id(0)

    @pl.when(i == 0)
    def _():
        acc_ref[...] = jnp.zeros_like(acc_ref)

    x = x_ref[...].astype(jnp.float32)
    sumsq = jnp.sum(x * x, axis=1, keepdims=True)
    h = x * jax.lax.rsqrt(jnp.maximum(sumsq, _EPS_NORMALIZE * _EPS_NORMALIZE))
    row_ids = i * tile_rows + jax.lax.broadcasted_iota(jnp.int32, h.shape, 0)
    h = jnp.where(row_ids < n_rows, h, 0.0).astype(mxu_dtype)

    # H^T @ H (contract over the row axis) into the resident f32 accumulator.
    acc_ref[...] += jax.lax.dot_general(
        h, h, dimension_numbers=(((0,), (0,)), ((), ())),
        preferred_element_type=jnp.float32)

    @pl.when(i == pl.num_programs(0) - 1)
    def _():
        s = acc_ref[...] * (1.0 / tau)
        if d_true < s.shape[1]:          # lane-padded: exclude padded columns
            col_ids = jax.lax.broadcasted_iota(jnp.int32, s.shape, 1)
            s = jnp.where(col_ids < d_true, s, -1e30)
        s = s - jnp.max(s, axis=1, keepdims=True)
        e = jnp.exp(s)
        sim_ref[...] = (e / jnp.sum(e, axis=1, keepdims=True)).astype(sim_ref.dtype)


def _cn_apply_kernel(sim_ref, x_ref, o_ref, *, scale, mxu_dtype):
    """CN pass 2: out = (1+scale)*x - scale * (H_tile @ sim).
    Out-of-range rows of a partial last tile compute garbage but are discarded
    by Pallas on writeback."""
    x = x_ref[...].astype(jnp.float32)
    sumsq = jnp.sum(x * x, axis=1, keepdims=True)
    h = x * jax.lax.rsqrt(jnp.maximum(sumsq, _EPS_NORMALIZE * _EPS_NORMALIZE))
    x_neg = jnp.dot(h.astype(mxu_dtype), sim_ref[...],
                    preferred_element_type=jnp.float32)
    o_ref[...] = ((1.0 + scale) * x - scale * x_neg).astype(o_ref.dtype)


# ---------------------------------------------------------------------------
# Launcher
# ---------------------------------------------------------------------------
def norm_layer(x, norm_mode="None", norm_scale=None, tau=1.0, adj=None,
               tile_rows=None, cn_bf16_matmul=False):
    """Mirrors NormLayer.forward; `adj` is unused in the reference too."""
    del adj
    if norm_mode == "None":
        return x
    if x.ndim != 2:
        raise ValueError("norm_layer expects a 2-D [N, D] input")

    n, d = x.shape
    # Lane-dense padding for small feature dims (zero columns are neutral for
    # every mode; LN / CN mask them in-kernel).
    xp = x if d >= _LANE else jnp.pad(x, ((0, 0), (0, _LANE - d)))
    d_pad = xp.shape[1]
    itemsize = x.dtype.itemsize
    vmem_limit = _vmem_limit_bytes()

    t = _choose_tile_rows(n, d_pad, itemsize, tile_rows)
    grid = (pl.cdiv(n, t),)
    x_spec = pl.BlockSpec((t, d_pad), lambda i: (i, 0))
    o_spec = pl.BlockSpec((t, d_pad), lambda i: (i, 0))
    out_shape = jax.ShapeDtypeStruct((n, d_pad), x.dtype)
    params_parallel = pltpu.CompilerParams(
        dimension_semantics=("parallel",), vmem_limit_bytes=vmem_limit)
    params_arbitrary = pltpu.CompilerParams(
        dimension_semantics=("arbitrary",), vmem_limit_bytes=vmem_limit)
    # bf16 MXU operands when the input is bf16 or explicitly requested;
    # f32 inputs keep exact f32 semantics by default.
    mxu_dtype = (jnp.bfloat16
                 if (x.dtype == jnp.bfloat16 or cn_bf16_matmul) else jnp.float32)

    if norm_mode == "LN":
        out = pl.pallas_call(
            functools.partial(_ln_kernel, d_true=d),
            out_shape=out_shape, grid=grid,
            in_specs=[x_spec], out_specs=o_spec,
            compiler_params=params_parallel)(xp)
        return _unpad(out, d)

    if norm_mode in ("PN", "PN-SI", "PN-SCS"):
        scale = float(norm_scale)
        if grid[0] == 1:
            # Whole array fits in one VMEM tile: fused single-pass kernel.
            fused = {"PN": _pn_fused_kernel,
                     "PN-SI": _pn_si_fused_kernel,
                     "PN-SCS": _pn_scs_fused_kernel}[norm_mode]
            out = pl.pallas_call(
                functools.partial(fused, scale=scale),
                out_shape=out_shape, grid=(1,),
                in_specs=[pl.BlockSpec((n, d_pad), lambda i: (0, 0))],
                out_specs=pl.BlockSpec((n, d_pad), lambda i: (0, 0)),
                compiler_params=params_parallel)(xp)
            return _unpad(out, d)

        # Two-pass path: pipelined column stats, then pipelined apply.
        mu, pn_scalar = pl.pallas_call(
            functools.partial(_col_stats_kernel, n_rows=n, tile_rows=t,
                              scale=scale),
            out_shape=(jax.ShapeDtypeStruct((1, d_pad), jnp.float32),
                       jax.ShapeDtypeStruct((1, 1), jnp.float32)),
            grid=grid,
            in_specs=[x_spec],
            out_specs=(pl.BlockSpec((1, d_pad), lambda i: (0, 0)),
                       pl.BlockSpec((1, 1), lambda i: (0, 0))),
            compiler_params=params_arbitrary)(xp)

        mu_spec = pl.BlockSpec((1, d_pad), lambda i: (0, 0))
        if norm_mode == "PN":
            kernel = _pn_apply_kernel
            inputs = (mu, pn_scalar, xp)
            in_specs = [mu_spec, pl.BlockSpec((1, 1), lambda i: (0, 0)), x_spec]
        elif norm_mode == "PN-SI":
            kernel = functools.partial(_pn_si_apply_kernel, scale=scale)
            inputs = (mu, xp)
            in_specs = [mu_spec, x_spec]
        else:  # PN-SCS
            kernel = functools.partial(_pn_scs_apply_kernel, scale=scale)
            inputs = (mu, xp)
            in_specs = [mu_spec, x_spec]
        out = pl.pallas_call(
            kernel, out_shape=out_shape, grid=grid,
            in_specs=in_specs, out_specs=o_spec,
            compiler_params=params_parallel)(*inputs)
        return _unpad(out, d)

    if norm_mode == "CN":
        scale = float(norm_scale)
        # 256-aligned row tiles keep the MXU contraction depth full on v6e/v7x.
        t_cn = _choose_tile_rows(n, d_pad, itemsize, tile_rows, align=256)
        grid_cn = (pl.cdiv(n, t_cn),)
        x_spec_cn = pl.BlockSpec((t_cn, d_pad), lambda i: (i, 0))
        sim = pl.pallas_call(
            functools.partial(_cn_sim_kernel, tau=float(tau), n_rows=n,
                              tile_rows=t_cn, d_true=d, mxu_dtype=mxu_dtype),
            out_shape=jax.ShapeDtypeStruct((d_pad, d_pad), mxu_dtype),
            grid=grid_cn,
            in_specs=[x_spec_cn],
            out_specs=pl.BlockSpec((d_pad, d_pad), lambda i: (0, 0)),
            scratch_shapes=[pltpu.VMEM((d_pad, d_pad), jnp.float32)],
            compiler_params=params_arbitrary)(xp)
        out = pl.pallas_call(
            functools.partial(_cn_apply_kernel, scale=scale,
                              mxu_dtype=mxu_dtype),
            out_shape=out_shape, grid=grid_cn,
            in_specs=[pl.BlockSpec((d_pad, d_pad), lambda i: (0, 0)), x_spec_cn],
            out_specs=pl.BlockSpec((t_cn, d_pad), lambda i: (i, 0)),
            compiler_params=params_parallel)(sim, xp)
        return _unpad(out, d)

    raise ValueError(f"unknown norm_mode {norm_mode!r}")


# ---------------------------------------------------------------------------
# Pure-JAX reference (direct transcription of the PyTorch forward)
# ---------------------------------------------------------------------------
def _reference(x, mode, scale=None, tau=1.0):
    x = x.astype(jnp.float32)
    if mode == "None":
        return x
    if mode == "LN":
        x = x - x.mean(axis=1, keepdims=True)
        nrm = jnp.sqrt(jnp.sum(x * x, axis=1, keepdims=True))
        x = x / jnp.maximum(nrm, _EPS_NORMALIZE)
    col_mean = x.mean(axis=0)
    if mode == "PN":
        x = x - col_mean
        rn = jnp.sqrt(_EPS_PAIRNORM + jnp.mean(jnp.sum(x * x, axis=1)))
        x = scale * x / rn
    if mode == "CN":
        nrm = jnp.sqrt(jnp.sum(x * x, axis=1, keepdims=True))
        h = x / jnp.maximum(nrm, _EPS_NORMALIZE)
        sim = jax.nn.softmax(h.T @ h / tau, axis=1)
        x = (1.0 + scale) * x - scale * (h @ sim)
    if mode == "PN-SI":
        x = x - col_mean
        rn = jnp.sqrt(_EPS_PAIRNORM + jnp.sum(x * x, axis=1, keepdims=True))
        x = scale * x / rn
    if mode == "PN-SCS":
        rn = jnp.sqrt(_EPS_PAIRNORM + jnp.sum(x * x, axis=1, keepdims=True))
        x = scale * x / rn - col_mean
    return x


if __name__ == "__main__":
    key = jax.random.PRNGKey(0)
    k_small, k_big = jax.random.split(key)
    scale, tau = 1.0, 1.0
    modes = ["None", "LN", "PN", "PN-SI", "PN-SCS", "CN"]

    # Small [N, D] with D < 128: exercises the lane-padding path and the fused
    # single-block PN kernels.
    x_small = jax.random.normal(k_small, (16, 32), dtype=jnp.float32)
    for mode in modes:
        out = jax.block_until_ready(
            norm_layer(x_small, norm_mode=mode, norm_scale=scale, tau=tau))
        ref = _reference(x_small, mode, scale=scale, tau=tau)
        assert out.shape == x_small.shape and out.dtype == x_small.dtype, mode
        assert bool(jnp.all(jnp.isfinite(out))), mode
        assert bool(jnp.allclose(out.astype(jnp.float32), ref,
                                 atol=2e-5, rtol=2e-5)), mode

    # Larger shape: multi-tile pipelined path, two-pass PN stats, CN row-tile
    # reduction and partial-last-tile masking (1000 = 3*256 + 232 rows).
    x_big = jax.random.normal(k_big, (1000, 128), dtype=jnp.float32)
    for mode in modes:
        out = jax.block_until_ready(
            norm_layer(x_big, norm_mode=mode, norm_scale=scale, tau=tau,
                       tile_rows=256))
        ref = _reference(x_big, mode, scale=scale, tau=tau)
        assert out.shape == x_big.shape and out.dtype == x_big.dtype, mode
        assert bool(jnp.all(jnp.isfinite(out))), mode
        assert bool(jnp.allclose(out.astype(jnp.float32), ref,
                                 atol=2e-4, rtol=2e-4)), mode

    # bf16: 16-row sublane alignment, bf16 MXU operands and bf16 sim storage.
    x_bf = x_big.astype(jnp.bfloat16)
    for mode in ["LN", "PN", "CN"]:
        out = jax.block_until_ready(
            norm_layer(x_bf, norm_mode=mode, norm_scale=scale, tau=tau,
                       tile_rows=256))
        ref = _reference(x_bf, mode, scale=scale, tau=tau)
        assert out.shape == x_bf.shape and out.dtype == jnp.bfloat16, mode
        assert bool(jnp.all(jnp.isfinite(out.astype(jnp.float32)))), mode
        assert bool(jnp.allclose(out.astype(jnp.float32), ref,
                                 atol=5e-2, rtol=5e-2)), mode

    print("KERNEL_OK")
</pallas_src>

<mosaic_0001>
module attributes {stable_mosaic.version = 11 : i64} {
  func.func @_ln_kernel(%arg0: i32, %arg1: memref<16x128xf32, #tpu.memory_space<vmem>>, %arg2: memref<16x128xf32, #tpu.memory_space<vmem>>) attributes {dimension_semantics = [#tpu.dimension_semantics<parallel>], iteration_bounds = array<i64: 1>, scalar_prefetch = 0 : i64, scratch_operands = 0 : i64, tpu.core_type = #tpu.core_type<tc>, window_params = [{transform_indices = @transform_0, window_bounds = array<i64: 16, 128>}, {transform_indices = @transform_1, window_bounds = array<i64: 16, 128>}]} {
    %c0 = arith.constant 0 : index
    %c0_0 = arith.constant 0 : index
    %0 = vector.load %arg1[%c0, %c0_0] : memref<16x128xf32, #tpu.memory_space<vmem>>, vector<16x128xf32>
    %cst = arith.constant dense<0.000000e+00> : vector<16xf32>
    %1 = vector.multi_reduction <add>, %0, %cst [1] : vector<16x128xf32> to vector<16xf32>
    %2 = vector.shape_cast %1 : vector<16xf32> to vector<16x1xf32>
    %cst_1 = arith.constant 3.125000e-02 : f32
    %3 = vector.broadcast %cst_1 : f32 to vector<16x1xf32>
    %4 = arith.mulf %2, %3 : vector<16x1xf32>
    %5 = vector.broadcast %4 : vector<16x1xf32> to vector<16x128xf32>
    %6 = arith.subf %0, %5 : vector<16x128xf32>
    %7 = tpu.iota {dimensions = array<i32: 1>} : vector<16x128xi32>
    %c32_i32 = arith.constant 32 : i32
    %8 = vector.broadcast %c32_i32 : i32 to vector<16x128xi32>
    %9 = arith.cmpi slt, %7, %8 : vector<16x128xi32>
    %cst_2 = arith.constant 0.000000e+00 : f32
    %10 = vector.broadcast %cst_2 : f32 to vector<16x128xf32>
    %11 = arith.select %9, %6, %10 : vector<16x128xi1>, vector<16x128xf32>
    %12 = arith.mulf %11, %11 : vector<16x128xf32>
    %cst_3 = arith.constant dense<0.000000e+00> : vector<16xf32>
    %13 = vector.multi_reduction <add>, %12, %cst_3 [1] : vector<16x128xf32> to vector<16xf32>
    %14 = vector.shape_cast %13 : vector<16xf32> to vector<16x1xf32>
    %cst_4 = arith.constant 1.000000e-24 : f32
    %15 = vector.broadcast %cst_4 : f32 to vector<16x1xf32>
    %16 = arith.maximumf %14, %15 : vector<16x1xf32>
    %17 = math.rsqrt %16 : vector<16x1xf32>
    %18 = vector.broadcast %17 : vector<16x1xf32> to vector<16x128xf32>
    %19 = arith.mulf %11, %18 : vector<16x128xf32>
    %c0_5 = arith.constant 0 : index
    %c0_6 = arith.constant 0 : index
    %20 = vector.load %arg2[%c0_5, %c0_6] : memref<16x128xf32, #tpu.memory_space<vmem>>, vector<16x128xf32>
    tpu.vector_store %arg2[%c0_5, %c0_6], %19 {strides = array<i32>} : memref<16x128xf32, #tpu.memory_space<vmem>>, vector<16x128xf32>,
    return
  }
  func.func @transform_0(%arg0: i32) -> (i32, i32) {
    %c0_i32 = arith.constant 0 : i32
    %c0_i32_0 = arith.constant 0 : i32
    return %arg0, %c0_i32 : i32, i32
  }
  func.func @transform_1(%arg0: i32) -> (i32, i32) {
    %c0_i32 = arith.constant 0 : i32
    %c0_i32_0 = arith.constant 0 : i32
    return %arg0, %c0_i32 : i32, i32
  }
}

</mosaic_0001>

<bundles_post_ra>
// kernel: tpu_custom_call.1
= control target key start
LH: loop header
LB: loop body
LE: loop exit
PB: predicated region body
PF: predicated region fallthrough
CT: control target
= control target key end

     0   :  { %6 = vsyncpa [#allocation3], 0  ;;  %s147_s0 = inlined_call_operand.hbm [shape: f32[16,128], index: 0, kind: input, shape index: {}]   ;;  %s148_s1 = inlined_call_operand.hbm [shape: f32[16,128], index: 1, kind: output, shape index: {}]  }
   0x1   :  { %7 = vsyncpa [#allocation4], 0  ;;  %s121_s6 = smov [#allocation2]  }
   0x2   :  { %s13_s7 = sshll.u32 %s121_s6, 4  ;;  %s14_s7 = int_to_ptr.vmem [resolvable:$true] %s13_s7 }
   0x3   :  { %s85_s8 = scalar_lea.vmem %s14_s7, 256  ;;  %p90_p1 = scmp.lt.s32.totalorder %s14_s7, %s14_s7 }
   0x4   :  { %p86_p0 = scmp.ne.s32.totalorder %s14_s7, %s85_s8  ;;  %p91_p2 = scmp.lt.s32.totalorder %s85_s8, %s85_s8 }
   0x6   :  { %p92_p3 = por %p91_p2, %p90_p1 }
   0x8   :  { %p93_p4 = pnand %p92_p3, %p86_p0 }
   0xa   :  { %96 = shalt.err (!%p93_p4)
}
   0xb   :  { %s122_s9 = smov 128   ;;  %s123_s10 = smov 8  }
   0xc   :  { %19 = dma.hbm_to_vmem [thread:$0]  %s147_s0, 256, %s14_s7, [#allocation3], %s122_s9, %s122_s9, %s123_s10  }
   0xd   :  { %117 = dma.done.wait [#allocation3], 256  }
   0xe   :  { %118 = vsyncadd [#allocation3], 4294967040  ;;  %v23_v0 = vld [vmem:[#allocation2] sm:$0xff]  ;;  %v24_v1 = vld [vmem:[#allocation2 + $0x8] sm:$0xff]  ;;  %v33_v2 = vlaneseq  ;;  %s124_s0 = smov [#allocation5]  }
   0xf   :  { %25 = vadd.xlane.f32.xlu0 %v23_v0  ;;  %s57_s13 = sshll.u32 %s124_s0, 4  ;;  %s58_s13 = int_to_ptr.vmem [resolvable:$true] %s57_s13 }
  0x10   :  { %v34_v3 = vand.u32 127, %v33_v2  ;;  %s97_s14 = scalar_lea.vmem %s58_s13, 256  ;;  %p102_p6 = scmp.lt.s32.totalorder %s58_s13, %s58_s13 }
  0x11   :  { %p98_p5 = scmp.ne.s32.totalorder %s58_s13, %s97_s14  ;;  %p103_p7 = scmp.lt.s32.totalorder %s97_s14, %s97_s14 }
  0x12   :  { %vm35_vm0 = vcmp.lt.s32.totalorder %v34_v3, 32 }
  0x13   :  { %27 = vadd.xlane.f32.xlu0 %v24_v1  ;;  %p104_p8 = por %p103_p7, %p102_p6 }
  0x15   :  { %p105_p9 = pnand %p104_p8, %p98_p5 }
  0x98   :  { %v26_v4 = vpop.xlane.xlu0 %25 }
  0x99   :  { %v29_v5 = vmul.f32 0.03125, %v26_v4 }
  0x9b   :  { %v31_v6 = vsub.f32 %v23_v0, %v29_v5 }
  0x9c   :  { %v28_v7 = vpop.xlane.xlu0 %27 }
  0x9d   :  { %v30_v8 = vmul.f32 0.03125, %v28_v7  ;;  %v36_v9 = vsel %vm35_vm0, %v31_v6, 0.0 }
  0x9e   :  { %v38_v10 = vmul.f32 %v36_v9, %v36_v9 }
  0x9f   :  { %v32_v11 = vsub.f32 %v24_v1, %v30_v8 }
  0xa0   :  { %40 = vadd.xlane.f32.xlu1 %v38_v10 }
  0xa1   :  { %v37_v12 = vsel %vm35_vm0, %v32_v11, 0.0 }
  0xa2   :  { %v39_v13 = vmul.f32 %v37_v12, %v37_v12 }
  0xa4   :  { %42 = vadd.xlane.f32.xlu1 %v39_v13 }
 0x129   :  { %v41_v14 = vpop.xlane.xlu1 %40 }
 0x12a   :  { %v44_v15 = vmax.f32 %v41_v14, 1e-24 }
 0x12c   :  { %73 = vrsqrt.f32 %v44_v15 }
 0x12d   :  { %v43_v16 = vpop.xlane.xlu1 %42 }
 0x12e   :  { %v45_v17 = vmax.f32 %v43_v16, 1e-24 }
 0x130   :  { %75 = vrsqrt.f32 %v45_v17 }
 0x139   :  { %v74_v18 = vpop.eup %73 }
 0x13a   :  { %v48_v19 = vmul.f32 %v74_v18, %v36_v9 }
 0x13c   :  { %50 = vst [vmem:[#allocation5] sm:$0xff] %v48_v19 }
 0x13d   :  { %v76_v20 = vpop.eup %75 }
 0x13e   :  { %v49_v21 = vmul.f32 %v76_v20, %v37_v12 }
 0x140   :  { %51 = vst [vmem:[#allocation5 + $0x8] sm:$0xff] %v49_v21 }
 0x141   :  { %108 = shalt.err (!%p105_p9)
}
 0x142   :  { %63 = dma.vmem_to_hbm [thread:$0]  %s58_s13, 256, %s148_s1, [#allocation4], %s122_s9, %s122_s9, %s123_s10  }
 0x143   :  { %119 = dma.done.wait [#allocation4], 256  }
 0x144   :  { %120 = vsyncadd [#allocation4], 4294967040 }
 0x145   :  { %67 = vsyncpa [#allocation3], 1 }
 0x146   :  { %68 = vsyncpa [#allocation4], 1 }

</bundles_post_ra>
